<compile_context>
chip_gen: v7x
topology: tpu7x:2x2x1
jax: 0.10.0
libtpu: 0.0.40
codegen_flags: <defaults>
</compile_context>

<pallas_src>
import math
import numpy as np
import jax
import jax.numpy as jnp
from jax.experimental import pallas as pl
from jax.experimental.pallas import tpu as pltpu

_NEG_SLOPE = 0.1      # GATv2Conv(negative_slope=0.1)
_BIG_NEG = 1e30


def _split_bf16(v):
    """f32 -> [hi | lo] bf16 concatenated on the lane axis.  A bf16 one-hot
    gather of this slab reproduces the f32 values to ~2^-16 relative error
    while keeping both MXU operands bf16 (fast path)."""
    hi = v.astype(jnp.bfloat16)
    lo = (v - hi.astype(jnp.float32)).astype(jnp.bfloat16)
    return jnp.concatenate([hi, lo], axis=-1)


# ---------------------------------------------------------------------------
# Phase A: edge-global work, executed exactly ONCE (hoisted out of the grid).
# Produces lane-dense [H, E] logits and the per-edge source messages [E, D].
# ---------------------------------------------------------------------------
def _edge_phase_kernel(x_ref, src_col_ref, dst_col_ref, ea_ref,
                       w_lr_ref, b_lr_ref, we_ref, att_t_ref,
                       logits_t_ref, x_l_ref):
    N, D = x_ref.shape
    E = ea_ref.shape[0]

    # Fused lin_l / lin_r: one 128-wide lane-dense node-level matmul.
    xlr = jnp.dot(x_ref[...], w_lr_ref[...],
                  preferred_element_type=jnp.float32) + b_lr_ref[...]    # [N, 2D]
    xl_n = xlr[:, :D]
    xr_n = xlr[:, D:]

    # Gather transformed node features onto edges with bf16 one-hot matmuls.
    # TODO(synk): swap for a DMA / scalar-prefetch gather on large graphs.
    e_iota = jax.lax.broadcasted_iota(jnp.int32, (E, N), 1)
    src_oh = (e_iota == src_col_ref[...]).astype(jnp.bfloat16)           # [E, N]
    dst_oh = (e_iota == dst_col_ref[...]).astype(jnp.bfloat16)           # [E, N]
    gl = jnp.dot(src_oh, _split_bf16(xl_n),
                 preferred_element_type=jnp.float32)                     # [E, 2D]
    gr = jnp.dot(dst_oh, _split_bf16(xr_n),
                 preferred_element_type=jnp.float32)                     # [E, 2D]
    x_l = gl[:, :D] + gl[:, D:]                                          # [E, D]
    x_r = gr[:, :D] + gr[:, D:]                                          # [E, D]

    e_f = jnp.dot(ea_ref[...], we_ref[...],
                  preferred_element_type=jnp.float32)                    # [E, D]

    s = x_l + x_r + e_f
    s = jnp.where(s >= 0.0, s, _NEG_SLOPE * s)                           # LeakyReLU

    # Per-head logits directly in lane-dense [H, E] layout (block-diagonal
    # attention matrix, one MXU matmul; no [E, H] path).
    logits_t_ref[...] = jax.lax.dot_general(
        att_t_ref[...], s, (((1,), (1,)), ((), ())),
        preferred_element_type=jnp.float32)                              # [H, E]
    x_l_ref[...] = x_l


# ---------------------------------------------------------------------------
# Phase B: per-node-block segment softmax, aggregation, residual + LN + GELU.
# Grid over node blocks, marked "parallel" (shards across v7x's 2 TCs).
# ---------------------------------------------------------------------------
def _node_phase_kernel(x_blk_ref, dst_row_ref, logits_t_ref, x_l_ref,
                       head_exp_ref, bias_ref, gamma_ref, beta_ref, out_ref):
    TN, D = x_blk_ref.shape
    H, E = logits_t_ref.shape
    nid0 = pl.program_id(0) * TN

    dst_row = dst_row_ref[...]                                           # [1, E]
    logits_t = logits_t_ref[...]                                         # [H, E]

    # Block-local adjacency: adj[n, e] = 1 iff edge e targets node nid0 + n.
    n_iota = jax.lax.broadcasted_iota(jnp.int32, (TN, E), 0) + nid0
    adj_f = (n_iota == dst_row).astype(jnp.float32)                      # [TN, E]
    neg = (adj_f - 1.0) * _BIG_NEG                                       # 0 / -1e30

    # Segment softmax, entirely in lane-dense [H, E] layout (H is tiny/static).
    node_max = jnp.concatenate(
        [jnp.max(logits_t[h:h + 1, :] + neg, axis=-1, keepdims=True)
         for h in range(H)], axis=-1)                                    # [TN, H]
    max_e = jax.lax.dot_general(node_max, adj_f, (((0,), (0,)), ((), ())),
                                preferred_element_type=jnp.float32)      # [H, E]
    in_blk = (dst_row >= nid0) & (dst_row < nid0 + TN)                   # [1, E]
    p = jnp.exp(jnp.where(in_blk, logits_t - max_e, -_BIG_NEG))          # [H, E]
    denom = jax.lax.dot_general(p, adj_f, (((1,), (1,)), ((), ())),
                                preferred_element_type=jnp.float32)      # [H, TN]
    denom_e = jnp.dot(denom, adj_f, preferred_element_type=jnp.float32)  # [H, E]
    alpha = p * pl.reciprocal(denom_e + 1e-16, approx=True)              # [H, E]

    # Expand per-head alpha over its channel span (0/1 matmul, exact), scale
    # the source messages, and do ONE lane-dense bf16 scatter matmul.
    alpha_full = jax.lax.dot_general(alpha, head_exp_ref[...],
                                     (((0,), (0,)), ((), ())),
                                     preferred_element_type=jnp.float32)  # [E, D]
    msg = (x_l_ref[...] * alpha_full).astype(jnp.bfloat16)               # [E, D]
    x1 = jnp.dot(adj_f.astype(jnp.bfloat16), msg,
                 preferred_element_type=jnp.float32) + bias_ref[...]     # [TN, D]

    # Residual + LayerNorm + GELU (exact erf).
    y = x_blk_ref[...] + x1
    mu = jnp.mean(y, axis=-1, keepdims=True)
    var = jnp.mean((y - mu) ** 2, axis=-1, keepdims=True)
    yn = (y - mu) * jax.lax.rsqrt(var + 1e-5)
    yn = yn * gamma_ref[...] + beta_ref[...]
    out = 0.5 * yn * (1.0 + jax.lax.erf(yn * (1.0 / math.sqrt(2.0))))
    # TODO(synk): nn.Dropout(p=0.3) is identity at inference; RNG not matched.
    # TODO(synk): D = 64 < 128 lanes -> lane-masked stores; a production kernel
    #             would pack two nodes per row ([TN/2, 128] out spec).
    out_ref[...] = out


def graph_trans_encoder_layer(x, edge_index, edge_attr, params, *, node_block=256):
    N, D = x.shape
    E = edge_index.shape[1]
    H, C = params["att"].shape
    assert H * C == D, "in_channels must equal heads * 32"

    f32 = jnp.float32
    x32 = x.astype(f32)
    ea32 = edge_attr.astype(f32)
    src_col = edge_index[0].astype(jnp.int32).reshape(E, 1)
    dst_col = edge_index[1].astype(jnp.int32).reshape(E, 1)
    dst_row = edge_index[1].astype(jnp.int32).reshape(1, E)

    # Fused lin_l / lin_r weights & biases -> one 128-wide node matmul.
    w_lr = jnp.concatenate([params["wl"], params["wr"]], axis=1).astype(f32)   # [D, 2D]
    b_lr = jnp.concatenate([params["bl"], params["br"]]).astype(f32).reshape(1, 2 * D)
    we = params["we"].astype(f32)
    att = params["att"].astype(f32)                                             # [H, C]
    # Block-diagonal attention matrix -> [H, E] logits in one matmul.
    att_t = (jnp.eye(H, dtype=f32)[:, :, None] * att[None, :, :]).reshape(H, D)  # [H, D]
    # 0/1 expansion used to broadcast per-head alpha over its channel span.
    head_exp = jnp.repeat(jnp.eye(H, dtype=f32), C, axis=1)                     # [H, D]
    bias = params["bias"].astype(f32).reshape(1, D)
    gamma = params["gamma"].astype(f32).reshape(1, D)
    beta = params["beta"].astype(f32).reshape(1, D)

    def _full(shape):
        return pl.BlockSpec(shape, lambda i: (0,) * len(shape))

    # ------------------------ Phase A: edge-global --------------------------
    a_inputs = [x32, src_col, dst_col, ea32, w_lr, b_lr, we, att_t]
    a_bytes = sum(int(np.prod(a.shape)) * a.dtype.itemsize for a in a_inputs)
    a_scratch = (2 * E * N * 2 + 4 * N * D * 2      # bf16 one-hots + split slabs
                 + 8 * E * D * 4 + 2 * N * 2 * D * 4)  # f32 edge/node temporaries
    a_vmem = int(min(48 << 20, max(16 << 20, 2 * (a_bytes + a_scratch))))

    logits_t, x_l = pl.pallas_call(
        _edge_phase_kernel,
        out_shape=(jax.ShapeDtypeStruct((H, E), f32),
                   jax.ShapeDtypeStruct((E, D), f32)),
        grid_spec=pltpu.PrefetchScalarGridSpec(
            num_scalar_prefetch=0,
            grid=(1,),
            in_specs=[_full(a.shape) for a in a_inputs],
            out_specs=[_full((H, E)), _full((E, D))],
        ),
        compiler_params=pltpu.CompilerParams(
            dimension_semantics=("arbitrary",),
            vmem_limit_bytes=a_vmem,
        ),
    )(*a_inputs)

    # --------------------- Phase B: per node block --------------------------
    # Large blocks amortize per-step overhead; TN must be a multiple of 8
    # (sublane tiling) that divides N, else fall back to a single block.
    TN = N if N <= node_block else node_block
    if TN % 8 != 0 or N % TN != 0:
        TN = N

    b_resident = [dst_row, logits_t, x_l, head_exp, bias, gamma, beta]
    b_bytes = sum(int(np.prod(a.shape)) * a.dtype.itemsize for a in b_resident)
    b_scratch = (4 * TN * E * 4      # adjacency / masked-max temporaries
                 + 3 * E * D * 4     # alpha_full / msg / x_l working copies
                 + 8 * H * E * 4     # [H, E] softmax temporaries
                 + 6 * TN * D * 4)   # x1 / LN / GELU temporaries
    b_vmem = int(min(48 << 20, max(16 << 20,
                                   b_bytes + 4 * TN * D * 4 + b_scratch)))

    return pl.pallas_call(
        _node_phase_kernel,
        out_shape=jax.ShapeDtypeStruct((N, D), f32),
        grid_spec=pltpu.PrefetchScalarGridSpec(
            num_scalar_prefetch=0,
            grid=(N // TN,),
            in_specs=[
                pl.BlockSpec((TN, D), lambda i: (i, 0)),   # residual node block
                _full((1, E)),                             # dst indices
                _full((H, E)),                             # logits (lane-dense)
                _full((E, D)),                             # source messages
                _full((H, D)),                             # head expansion
                _full((1, D)), _full((1, D)), _full((1, D)),  # bias, gamma, beta
            ],
            out_specs=pl.BlockSpec((TN, D), lambda i: (i, 0)),
        ),
        compiler_params=pltpu.CompilerParams(
            dimension_semantics=("parallel",),   # node blocks shard across 2 TCs
            vmem_limit_bytes=b_vmem,
        ),
    )(x32, dst_row, logits_t, x_l, head_exp, bias, gamma, beta)


def reference(x, edge_index, edge_attr, params):
    """Pure-JAX reference mirroring PyG GATv2Conv + residual/LN/GELU."""
    N, D = x.shape
    H, C = params["att"].shape
    src, dst = edge_index[0], edge_index[1]
    x_l = (x @ params["wl"] + params["bl"])[src].reshape(-1, H, C)
    x_r = (x @ params["wr"] + params["br"])[dst].reshape(-1, H, C)
    e_f = (edge_attr @ params["we"]).reshape(-1, H, C)
    s = x_l + x_r + e_f
    s = jnp.where(s >= 0.0, s, 0.1 * s)
    logits = jnp.sum(s * params["att"][None], axis=-1)                 # [E, H]
    m = jax.ops.segment_max(logits, dst, num_segments=N)
    p = jnp.exp(logits - m[dst])
    denom = jax.ops.segment_sum(p, dst, num_segments=N) + 1e-16
    alpha = p / denom[dst]
    msg = (x_l * alpha[..., None]).reshape(-1, H * C)
    x1 = jax.ops.segment_sum(msg, dst, num_segments=N) + params["bias"]
    y = x + x1
    mu = y.mean(-1, keepdims=True)
    var = ((y - mu) ** 2).mean(-1, keepdims=True)
    yn = (y - mu) / jnp.sqrt(var + 1e-5) * params["gamma"] + params["beta"]
    return 0.5 * yn * (1.0 + jax.lax.erf(yn / math.sqrt(2.0)))


if __name__ == "__main__":
    key = jax.random.PRNGKey(0)
    D = 64                      # in_channels; heads = D // 32 = 2, 32 per head
    H, C = D // 32, 32
    N, E = 16, 32               # small graph; N divisible by the 8-node blocks

    ks = jax.random.split(key, 8)
    x = jax.random.normal(ks[0], (N, D), jnp.float32)
    src = jax.random.randint(ks[1], (E,), 0, N, dtype=jnp.int32)
    dst = jax.random.randint(ks[2], (E,), 0, N, dtype=jnp.int32)
    edge_index = jnp.stack([src, dst], axis=0)
    edge_attr = jax.random.normal(ks[3], (E, D), jnp.float32)

    def glorot(k, shp):
        lim = math.sqrt(6.0 / (shp[0] + shp[-1]))
        return jax.random.uniform(k, shp, jnp.float32, -lim, lim)

    params = dict(
        wl=glorot(ks[4], (D, H * C)), bl=jnp.zeros((D,), jnp.float32),
        wr=glorot(ks[5], (D, H * C)), br=jnp.zeros((D,), jnp.float32),
        we=glorot(ks[6], (D, H * C)),
        att=glorot(ks[7], (H, C)),
        bias=jnp.zeros((D,), jnp.float32),
        gamma=jnp.ones((D,), jnp.float32),
        beta=jnp.zeros((D,), jnp.float32),
    )
    # NOTE: self.lin in the PyTorch module is unused in forward(), so omitted.

    ref = reference(x, edge_index, edge_attr, params)

    # Default path: one large node block (TN = N for this toy graph).
    out = graph_trans_encoder_layer(x, edge_index, edge_attr, params)
    jax.block_until_ready(out)
    np.testing.assert_allclose(np.asarray(out), np.asarray(ref),
                               rtol=2e-2, atol=2e-2)

    # Multi-block path: two node blocks of 8 exercise the in-block masking and
    # the "parallel" grid.
    out2 = graph_trans_encoder_layer(x, edge_index, edge_attr, params,
                                     node_block=8)
    jax.block_until_ready(out2)
    np.testing.assert_allclose(np.asarray(out2), np.asarray(ref),
                               rtol=2e-2, atol=2e-2)

    print("KERNEL_OK")
</pallas_src>

<mosaic_0001>
module attributes {stable_mosaic.version = 11 : i64} {
  func.func @_edge_phase_kernel(%arg0: i32, %arg1: memref<16x64xf32, #tpu.memory_space<vmem>>, %arg2: memref<32x1xi32, #tpu.memory_space<vmem>>, %arg3: memref<32x1xi32, #tpu.memory_space<vmem>>, %arg4: memref<32x64xf32, #tpu.memory_space<vmem>>, %arg5: memref<64x128xf32, #tpu.memory_space<vmem>>, %arg6: memref<1x128xf32, #tpu.memory_space<vmem>>, %arg7: memref<64x64xf32, #tpu.memory_space<vmem>>, %arg8: memref<2x64xf32, #tpu.memory_space<vmem>>, %arg9: memref<2x32xf32, #tpu.memory_space<vmem>>, %arg10: memref<32x64xf32, #tpu.memory_space<vmem>>) attributes {dimension_semantics = [#tpu.dimension_semantics<arbitrary>], iteration_bounds = array<i64: 1>, scalar_prefetch = 0 : i64, scratch_operands = 0 : i64, tpu.core_type = #tpu.core_type<tc>, window_params = [{pipeline_mode = #tpu.pipeline_mode<synchronous>, transform_indices = @transform_0, window_bounds = array<i64: 16, 64>}, {pipeline_mode = #tpu.pipeline_mode<synchronous>, transform_indices = @transform_1, window_bounds = array<i64: 32, 1>}, {pipeline_mode = #tpu.pipeline_mode<synchronous>, transform_indices = @transform_2, window_bounds = array<i64: 32, 1>}, {pipeline_mode = #tpu.pipeline_mode<synchronous>, transform_indices = @transform_3, window_bounds = array<i64: 32, 64>}, {pipeline_mode = #tpu.pipeline_mode<synchronous>, transform_indices = @transform_4, window_bounds = array<i64: 64, 128>}, {pipeline_mode = #tpu.pipeline_mode<synchronous>, transform_indices = @transform_5, window_bounds = array<i64: 1, 128>}, {pipeline_mode = #tpu.pipeline_mode<synchronous>, transform_indices = @transform_6, window_bounds = array<i64: 64, 64>}, {pipeline_mode = #tpu.pipeline_mode<synchronous>, transform_indices = @transform_7, window_bounds = array<i64: 2, 64>}, {pipeline_mode = #tpu.pipeline_mode<synchronous>, transform_indices = @transform_8, window_bounds = array<i64: 2, 32>}, {pipeline_mode = #tpu.pipeline_mode<synchronous>, transform_indices = @transform_9, window_bounds = array<i64: 32, 64>}]} {
    %c0 = arith.constant 0 : index
    %c0_0 = arith.constant 0 : index
    %0 = vector.load %arg1[%c0, %c0_0] : memref<16x64xf32, #tpu.memory_space<vmem>>, vector<16x64xf32>
    %c0_1 = arith.constant 0 : index
    %c0_2 = arith.constant 0 : index
    %1 = vector.load %arg5[%c0_1, %c0_2] : memref<64x128xf32, #tpu.memory_space<vmem>>, vector<64x128xf32>
    %cst = arith.constant dense<0.000000e+00> : vector<16x128xf32>
    %2 = tpu.matmul %0, %1, %cst {dimension_numbers = #tpu.dot_dimension_numbers<[1], [0], [0], [1], [0, 0, 1, 1], [], []>} : vector<16x64xf32>, vector<64x128xf32>, vector<16x128xf32> -> vector<16x128xf32>
    %c0_3 = arith.constant 0 : index
    %c0_4 = arith.constant 0 : index
    %3 = vector.load %arg6[%c0_3, %c0_4] : memref<1x128xf32, #tpu.memory_space<vmem>>, vector<1x128xf32>
    %4 = vector.broadcast %3 : vector<1x128xf32> to vector<16x128xf32>
    %5 = arith.addf %2, %4 : vector<16x128xf32>
    %6 = vector.extract_strided_slice %5 {offsets = [0, 0], sizes = [16, 64], strides = [1, 1]} : vector<16x128xf32> to vector<16x64xf32>
    %7 = vector.extract_strided_slice %5 {offsets = [0, 64], sizes = [16, 64], strides = [1, 1]} : vector<16x128xf32> to vector<16x64xf32>
    %8 = tpu.iota {dimensions = array<i32: 1>} : vector<32x16xi32>
    %c0_5 = arith.constant 0 : index
    %c0_6 = arith.constant 0 : index
    %9 = vector.load %arg2[%c0_5, %c0_6] : memref<32x1xi32, #tpu.memory_space<vmem>>, vector<32x1xi32>
    %10 = vector.broadcast %9 : vector<32x1xi32> to vector<32x16xi32>
    %11 = arith.cmpi eq, %8, %10 : vector<32x16xi32>
    %12 = arith.extui %11 : vector<32x16xi1> to vector<32x16xi32>
    %13 = arith.sitofp %12 : vector<32x16xi32> to vector<32x16xf32>
    %14 = arith.truncf %13 : vector<32x16xf32> to vector<32x16xbf16>
    %c0_7 = arith.constant 0 : index
    %c0_8 = arith.constant 0 : index
    %15 = vector.load %arg3[%c0_7, %c0_8] : memref<32x1xi32, #tpu.memory_space<vmem>>, vector<32x1xi32>
    %16 = vector.broadcast %15 : vector<32x1xi32> to vector<32x16xi32>
    %17 = arith.cmpi eq, %8, %16 : vector<32x16xi32>
    %18 = arith.extui %17 : vector<32x16xi1> to vector<32x16xi32>
    %19 = arith.sitofp %18 : vector<32x16xi32> to vector<32x16xf32>
    %20 = arith.truncf %19 : vector<32x16xf32> to vector<32x16xbf16>
    %21 = arith.truncf %6 : vector<16x64xf32> to vector<16x64xbf16>
    %22 = arith.extf %21 : vector<16x64xbf16> to vector<16x64xf32>
    %23 = arith.subf %6, %22 : vector<16x64xf32>
    %24 = arith.truncf %23 : vector<16x64xf32> to vector<16x64xbf16>
    %25 = tpu.concatenate %21, %24 in 1 : vector<16x64xbf16>, vector<16x64xbf16> -> vector<16x128xbf16>
    %cst_9 = arith.constant dense<0.000000e+00> : vector<32x128xf32>
    %26 = tpu.matmul %14, %25, %cst_9 {dimension_numbers = #tpu.dot_dimension_numbers<[1], [0], [0], [1], [0, 0, 1, 1], [], []>} : vector<32x16xbf16>, vector<16x128xbf16>, vector<32x128xf32> -> vector<32x128xf32>
    %27 = arith.truncf %7 : vector<16x64xf32> to vector<16x64xbf16>
    %28 = arith.extf %27 : vector<16x64xbf16> to vector<16x64xf32>
    %29 = arith.subf %7, %28 : vector<16x64xf32>
    %30 = arith.truncf %29 : vector<16x64xf32> to vector<16x64xbf16>
    %31 = tpu.concatenate %27, %30 in 1 : vector<16x64xbf16>, vector<16x64xbf16> -> vector<16x128xbf16>
    %cst_10 = arith.constant dense<0.000000e+00> : vector<32x128xf32>
    %32 = tpu.matmul %20, %31, %cst_10 {dimension_numbers = #tpu.dot_dimension_numbers<[1], [0], [0], [1], [0, 0, 1, 1], [], []>} : vector<32x16xbf16>, vector<16x128xbf16>, vector<32x128xf32> -> vector<32x128xf32>
    %33 = vector.extract_strided_slice %26 {offsets = [0, 0], sizes = [32, 64], strides = [1, 1]} : vector<32x128xf32> to vector<32x64xf32>
    %34 = vector.extract_strided_slice %26 {offsets = [0, 64], sizes = [32, 64], strides = [1, 1]} : vector<32x128xf32> to vector<32x64xf32>
    %35 = arith.addf %33, %34 : vector<32x64xf32>
    %36 = vector.extract_strided_slice %32 {offsets = [0, 0], sizes = [32, 64], strides = [1, 1]} : vector<32x128xf32> to vector<32x64xf32>
    %37 = vector.extract_strided_slice %32 {offsets = [0, 64], sizes = [32, 64], strides = [1, 1]} : vector<32x128xf32> to vector<32x64xf32>
    %38 = arith.addf %36, %37 : vector<32x64xf32>
    %c0_11 = arith.constant 0 : index
    %c0_12 = arith.constant 0 : index
    %39 = vector.load %arg4[%c0_11, %c0_12] : memref<32x64xf32, #tpu.memory_space<vmem>>, vector<32x64xf32>
    %c0_13 = arith.constant 0 : index
    %c0_14 = arith.constant 0 : index
    %40 = vector.load %arg7[%c0_13, %c0_14] : memref<64x64xf32, #tpu.memory_space<vmem>>, vector<64x64xf32>
    %cst_15 = arith.constant dense<0.000000e+00> : vector<32x64xf32>
    %41 = tpu.matmul %39, %40, %cst_15 {dimension_numbers = #tpu.dot_dimension_numbers<[1], [0], [0], [1], [0, 0, 1, 1], [], []>} : vector<32x64xf32>, vector<64x64xf32>, vector<32x64xf32> -> vector<32x64xf32>
    %42 = arith.addf %35, %38 : vector<32x64xf32>
    %43 = arith.addf %42, %41 : vector<32x64xf32>
    %cst_16 = arith.constant 0.000000e+00 : f32
    %44 = vector.broadcast %cst_16 : f32 to vector<32x64xf32>
    %45 = arith.cmpf oge, %43, %44 : vector<32x64xf32>
    %cst_17 = arith.constant 1.000000e-01 : f32
    %46 = vector.broadcast %cst_17 : f32 to vector<32x64xf32>
    %47 = arith.mulf %46, %43 : vector<32x64xf32>
    %48 = arith.select %45, %43, %47 : vector<32x64xi1>, vector<32x64xf32>
    %c0_18 = arith.constant 0 : index
    %c0_19 = arith.constant 0 : index
    %49 = vector.load %arg8[%c0_18, %c0_19] : memref<2x64xf32, #tpu.memory_space<vmem>>, vector<2x64xf32>
    %cst_20 = arith.constant dense<0.000000e+00> : vector<2x32xf32>
    %50 = tpu.matmul %49, %48, %cst_20 {dimension_numbers = #tpu.dot_dimension_numbers<[1], [1], [0], [0], [0, 0, 1, 0], [], []>} : vector<2x64xf32>, vector<32x64xf32>, vector<2x32xf32> -> vector<2x32xf32>
    %c0_21 = arith.constant 0 : index
    %c0_22 = arith.constant 0 : index
    %51 = vector.load %arg9[%c0_21, %c0_22] : memref<2x32xf32, #tpu.memory_space<vmem>>, vector<2x32xf32>
    tpu.vector_store %arg9[%c0_21, %c0_22], %50 {strides = array<i32>} : memref<2x32xf32, #tpu.memory_space<vmem>>, vector<2x32xf32>,
    %c0_23 = arith.constant 0 : index
    %c0_24 = arith.constant 0 : index
    %52 = vector.load %arg10[%c0_23, %c0_24] : memref<32x64xf32, #tpu.memory_space<vmem>>, vector<32x64xf32>
    tpu.vector_store %arg10[%c0_23, %c0_24], %35 {strides = array<i32>} : memref<32x64xf32, #tpu.memory_space<vmem>>, vector<32x64xf32>,
    return
  }
  func.func @transform_0(%arg0: i32) -> (i32, i32) {
    %c0_i32 = arith.constant 0 : i32
    %c0_i32_0 = arith.constant 0 : i32
    %c0_i32_1 = arith.constant 0 : i32
    return %c0_i32, %c0_i32_0 : i32, i32
  }
  func.func @transform_1(%arg0: i32) -> (i32, i32) {
    %c0_i32 = arith.constant 0 : i32
    %c0_i32_0 = arith.constant 0 : i32
    %c0_i32_1 = arith.constant 0 : i32
    return %c0_i32, %c0_i32_0 : i32, i32
  }
  func.func @transform_2(%arg0: i32) -> (i32, i32) {
    %c0_i32 = arith.constant 0 : i32
    %c0_i32_0 = arith.constant 0 : i32
    %c0_i32_1 = arith.constant 0 : i32
    return %c0_i32, %c0_i32_0 : i32, i32
  }
  func.func @transform_3(%arg0: i32) -> (i32, i32) {
    %c0_i32 = arith.constant 0 : i32
    %c0_i32_0 = arith.constant 0 : i32
    %c0_i32_1 = arith.constant 0 : i32
    return %c0_i32, %c0_i32_0 : i32, i32
  }
  func.func @transform_4(%arg0: i32) -> (i32, i32) {
    %c0_i32 = arith.constant 0 : i32
    %c0_i32_0 = arith.constant 0 : i32
    %c0_i32_1 = arith.constant 0 : i32
    return %c0_i32, %c0_i32_0 : i32, i32
  }
  func.func @transform_5(%arg0: i32) -> (i32, i32) {
    %c0_i32 = arith.constant 0 : i32
    %c0_i32_0 = arith.constant 0 : i32
    %c0_i32_1 = arith.constant 0 : i32
    return %c0_i32, %c0_i32_0 : i32, i32
  }
  func.func @transform_6(%arg0: i32) -> (i32, i32) {
    %c0_i32 = arith.constant 0 : i32
    %c0_i32_0 = arith.constant 0 : i32
    %c0_i32_1 = arith.constant 0 : i32
    return %c0_i32, %c0_i32_0 : i32, i32
  }
  func.func @transform_7(%arg0: i32) -> (i32, i32) {
    %c0_i32 = arith.constant 0 : i32
    %c0_i32_0 = arith.constant 0 : i32
    %c0_i32_1 = arith.constant 0 : i32
    return %c0_i32, %c0_i32_0 : i32, i32
  }
  func.func @transform_8(%arg0: i32) -> (i32, i32) {
    %c0_i32 = arith.constant 0 : i32
    %c0_i32_0 = arith.constant 0 : i32
    %c0_i32_1 = arith.constant 0 : i32
    return %c0_i32, %c0_i32_0 : i32, i32
  }
  func.func @transform_9(%arg0: i32) -> (i32, i32) {
    %c0_i32 = arith.constant 0 : i32
    %c0_i32_0 = arith.constant 0 : i32
    %c0_i32_1 = arith.constant 0 : i32
    return %c0_i32, %c0_i32_0 : i32, i32
  }
}

</mosaic_0001>

<bundles_post_ra>
// kernel: tpu_custom_call.1
= control target key start
LH: loop header
LB: loop body
LE: loop exit
PB: predicated region body
PF: predicated region fallthrough
CT: control target
= control target key end

     0   :  { %15 = vsyncpa [#allocation3], 0  ;;  %s1133_s0 = inlined_call_operand.vmem [shape: f32[16,64], index: 0, kind: input, shape index: {}]   ;;  %s1134_s1 = inlined_call_operand.vmem [shape: s32[32,1], index: 1, kind: input, shape index: {}]   ;;  %s1135_s2 = inlined_call_operand.vmem [shape: s32[32,1], index: 2, kind: input, shape index: {}]   ;;  %s1136_s3 = inlined_call_operand.hbm [shape: f32[32,64], index: 3, kind: input, shape index: {}]   ;;  %s1137_s4 = inlined_call_operand.vmem [shape: f32[64,128], index: 4, kind: input, shape index: {}]   ;;  %s1138_s5 = inlined_call_operand.vmem [shape: f32[1,128], index: 5, kind: input, shape index: {}]   ;;  %s1139_s6 = inlined_call_operand.hbm [shape: f32[64,64], index: 6, kind: input, shape index: {}]   ;;  %s1140_s7 = inlined_call_operand.vmem [shape: f32[2,64], index: 7, kind: input, shape index: {}]   ;;  %s1141_s8 = inlined_call_operand.hbm [shape: f32[2,32], index: 8, kind: output, shape index: {0}]   ;;  %s1142_s9 = inlined_call_operand.hbm [shape: f32[32,64], index: 9, kind: output, shape index: {1}]  }
   0x1   :  { %16 = vsyncpa [#allocation6], 0 }
   0x2   :  { %17 = vsyncpa [#allocation4], 0 }
   0x3   :  { %18 = vsyncpa [#allocation9], 0  ;;  %s917_s30 = smov [#allocation2]   ;;  %s821_s13 = scalar_lea.hbm %s1136_s3, 512 }
   0x4   :  { %s30_s10 = sshll.u32 %s917_s30, 4  ;;  %p822_p0 = scmp.ne.s32.totalorder %s1136_s3, %s821_s13  ;;  %s31_s10 = int_to_ptr.vmem [resolvable:$true] %s30_s10 }
   0x5   :  { %p825_p1 = scmp.lt.u32.totalorder %s821_s13, %s1136_s3 }
   0x7   :  { %p827_p2 = pnand %p825_p1, %p822_p0 }
   0x9   :  { %830 = shalt.err (!%p827_p2)
}
   0xa   :  { %s831_s18 = scalar_lea.vmem %s31_s10, 512  ;;  %p836_p4 = scmp.lt.s32.totalorder %s31_s10, %s31_s10 }
   0xb   :  { %p832_p3 = scmp.ne.s32.totalorder %s31_s10, %s831_s18  ;;  %p837_p5 = scmp.lt.s32.totalorder %s831_s18, %s831_s18 }
   0xd   :  { %p838_p6 = por %p837_p5, %p836_p4 }
   0xf   :  { %p839_p7 = pnand %p838_p6, %p832_p3 }
  0x11   :  { %842 = shalt.err (!%p839_p7)
}
  0x12   :  { %s918_s19 = smov 128   ;;  %s919_s20 = smov 8  }
  0x13   :  { %36 = dma.hbm_to_vmem [thread:$0]  %s1136_s3, 512, %s31_s10, [#allocation3], %s918_s19, %s918_s19, %s919_s20  }
  0x14   :  { %s920_s23 = smov [#allocation5]   ;;  %s843_s27 = scalar_lea.hbm %s1139_s6, 1024 }
  0x15   :  { %s46_s24 = sshll.u32 %s920_s23, 4  ;;  %p844_p8 = scmp.ne.s32.totalorder %s1139_s6, %s843_s27  ;;  %s47_s24 = int_to_ptr.vmem [resolvable:$true] %s46_s24 }
  0x16   :  { %p847_p9 = scmp.lt.u32.totalorder %s843_s27, %s1139_s6 }
  0x18   :  { %p849_p10 = pnand %p847_p9, %p844_p8 }
  0x1a   :  { %852 = shalt.err (!%p849_p10)
}
  0x1b   :  { %s853_s12 = scalar_lea.vmem %s47_s24, 1024  ;;  %p858_p12 = scmp.lt.s32.totalorder %s47_s24, %s47_s24 }
  0x1c   :  { %p854_p11 = scmp.ne.s32.totalorder %s47_s24, %s853_s12  ;;  %p859_p13 = scmp.lt.s32.totalorder %s853_s12, %s853_s12 }
  0x1e   :  { %p860_p0 = por %p859_p13, %p858_p12 }
  0x20   :  { %p861_p1 = pnand %p860_p0, %p854_p11 }
  0x22   :  { %864 = shalt.err (!%p861_p1)
}
  0x23   :  { %52 = dma.hbm_to_vmem [thread:$0]  %s1139_s6, 1024, %s47_s24, [#allocation6], %s918_s19, %s918_s19, %s919_s20  }
  0x24   :  { %909 = dma.done.wait [#allocation3], 512  }
  0x25   :  { %910 = vsyncadd [#allocation3], 4294966784 }
  0x26   :  { %911 = dma.done.wait [#allocation6], 1024  }
  0x27   :  { %912 = vsyncadd [#allocation6], 4294966272  ;;  %v921_v0 = vmov 0   ;;  %v64_v1 = vld [vmem:[%s1137_s4] sm:$0xff]  ;;  %v65_v2 = vld [vmem:[%s1137_s4 + $0x8] sm:$0xff]  ;;  %vm79_vm0 = vcmask 523264   ;;  %v161_v22 = vlaneseq }
  0x28   :  { %820 = vset.pattern.permute.xlu1 %v921_v0  ;;  %819 = vset.pattern.permute.xlu0 %v921_v0  ;;  %v66_v3 = vld [vmem:[%s1137_s4 + $0x10] sm:$0xff]  ;;  %v768_v4 = vpack.c.bf16 %v65_v2, %v64_v1  ;;  %v67_v5 = vld [vmem:[%s1137_s4 + $0x18] sm:$0xff]  ;;  %v68_v7 = vld [vmem:[%s1137_s4 + $0x20] sm:$0xff]  ;;  %v922_v26 = vmov 0.0   ;;  %vm236_vm3 = vcmask 130048   ;;  %s923_s26 = smov 64  }
  0x29   :  { %v772_v6 = vpack.c.bf16 %v67_v5, %v66_v3  ;;  %v69_v8 = vld [vmem:[%s1137_s4 + $0x28] sm:$0xff]  ;;  %v62_v9 = vld [vmem:[%s1133_s0] sm:$0xff]  ;;  %v165_v10 = vld [vmem:[%s1134_s1 + $0x10] sm:$0xff]  ;;  %v162_v24 = vand.u32 127, %v161_v22  ;;  %vm925_vm10 = vmmov 0   ;;  %s926_s29 = smov [#allocation8]  }
  0x2a   :  { %769 = vmatprep.subr.bf16.mxu0 %v768_v4  ;;  %720 = vmatprep.mubr.msk.f32.mxu0 %vm79_vm0, %v62_v9  ;;  %v163_v11 = vld [vmem:[%s1134_s1] sm:$0xff]  ;;  %v776_v12 = vpack.c.bf16 %v69_v8, %v68_v7  ;;  %v166_v13 = vld [vmem:[%s1134_s1 + $0x18] sm:$0xff]  ;;  %v70_v14 = vld [vmem:[%s1137_s4 + $0x30] sm:$0xff]  ;;  %s630_s30 = sshll.u32 %s926_s29, 4  ;;  %s631_s30 = int_to_ptr.vmem [resolvable:$true] %s630_s30 }
  0x2b   :  { %771 = vmatpush3.bf16.msra.mxu0 %v768_v4  ;;  %174 = vperm.xlu1 %820, %v165_v10   ;;  %v71_v15 = vld [vmem:[%s1137_s4 + $0x38] sm:$0xff]  ;;  %v164_v16 = vld [vmem:[%s1134_s1 + $0x8] sm:$0xff]  ;;  %v193_v18 = vld [vmem:[%s1135_s2] sm:$0xff]  ;;  %s865_s11 = scalar_lea.vmem %s631_s30, 512  ;;  %p870_p3 = scmp.lt.s32.totalorder %s631_s30, %s631_s30 }
  0x2c   :  { %773 = vmatprep.subr.bf16.mxu0 %v772_v6  ;;  %168 = vperm.xlu0 %819, %v163_v11   ;;  %v780_v17 = vpack.c.bf16 %v71_v15, %v70_v14  ;;  %v194_v19 = vld [vmem:[%s1135_s2 + $0x8] sm:$0xff]  ;;  %v195_v20 = vld [vmem:[%s1135_s2 + $0x10] sm:$0xff]  ;;  %v647_v30 = vld [vmem:[%s1138_s5] ss:$0 sm:$0xff]  ;;  %p866_p2 = scmp.ne.s32.totalorder %s631_s30, %s865_s11  ;;  %p871_p4 = scmp.lt.s32.totalorder %s865_s11, %s865_s11 }
  0x2d   :  { %v63_v21 = vld [vmem:[%s1133_s0 + $0x8] sm:$0xff]  ;;  %v196_v41 = vld [vmem:[%s1135_s2 + $0x18] sm:$0xff]  ;;  %v398_v52 = vld [vmem:[#allocation5] sm:$0xff] }
  0x2e   :  { %v399_v53 = vld [vmem:[#allocation5 + $0x8] sm:$0xff]  ;;  %v400_v61 = vld [vmem:[#allocation5 + $0x10] sm:$0xff]  ;;  %v401_v62 = vld [vmem:[#allocation5 + $0x18] sm:$0xff]  ;;  %p872_p5 = por %p871_p4, %p870_p3 }
  0x2f   :  { %775 = vmatpush3.bf16.msra.mxu0 %v772_v6  ;;  %177 = vperm.xlu1 %820, %v166_v13   ;;  %v784_v58 = vpack.c.bf16 %v399_v53, %v398_v52  ;;  %v788_v2 = vpack.c.bf16 %v401_v62, %v400_v61  ;;  %v394_v3 = vld [vmem:[#allocation2] sm:$0xff]  ;;  %v403_v5 = vld [vmem:[#allocation5 + $0x28] sm:$0xff]  ;;  %v404_v7 = vld [vmem:[#allocation5 + $0x30] sm:$0xff] }
  0x30   :  { %777 = vmatprep.subr.bf16.mxu0 %v776_v12  ;;  %171 = vperm.xlu0 %819, %v164_v16   ;;  %v402_v4 = vld [vmem:[#allocation5 + $0x20] sm:$0xff]  ;;  %v405_v8 = vld [vmem:[#allocation5 + $0x38] sm:$0xff]  ;;  %v395_v10 = vld [vmem:[#allocation2 + $0x8] sm:$0xff]  ;;  %p873_p6 = pnand %p872_p5, %p866_p2 }
  0x31   :  { %v792_v6 = vpack.c.bf16 %v403_v5, %v402_v4  ;;  %v796_v9 = vpack.c.bf16 %v405_v8, %v404_v7  ;;  %v396_v11 = vld [vmem:[#allocation2 + $0x10] sm:$0xff]  ;;  %vm802_vm13 = vmpackc.low %vm79_vm0, %vm79_vm0 }
  0x33   :  { %779 = vmatpush3.bf16.msra.mxu0 %v776_v12  ;;  %198 = vperm.xlu1 %820, %v193_v18   ;;  %v397_v12 = vld [vmem:[#allocation2 + $0x18] sm:$0xff] }
  0x34   :  { %781 = vmatprep.subr.bf16.mxu0 %v780_v17  ;;  %201 = vperm.xlu0 %819, %v194_v19   ;;  %v924_v19 = vmov 0.0|0.0  }
  0x37   :  { %783 = vmatpush3.bf16.msra.mxu0 %v780_v17  ;;  %204 = vperm.xlu1 %820, %v195_v20  }
  0x38   :  { %800 = vmatprep.subr.bf16.mxu0 %v924_v19 }
  0x3a   :  { %721 = vmatmul.mubr.msk.f32.vlgmr.msra.gmra.mrb[0].mxu0 %vm79_vm0, %v63_v21 }
  0x3b   :  { %765 = vmatprep.mubr.msk.f32.mxu0 %vm925_vm10, %v922_v26 }
  0xaa   :  { %v175_v42 = vpop.permute.xlu1 %174 }
  0xab   :  { %v169_v23 = vpop.permute.xlu0 %168  ;;  %vm181_vm4 = vcmp.eq.s32.totalorder %v162_v24, %v175_v42 }
  0xac   :  { %vm179_vm1 = vcmp.eq.s32.totalorder %v162_v24, %v169_v23  ;;  %v652_v47 = vsel %vm181_vm4, 1.0, %v922_v26 }
  0xad   :  { %v650_v27 = vsel %vm179_vm1, 1.0, %v922_v26 }
  0xae   :  { %v178_v43 = vpop.permute.xlu1 %177 }
  0xaf   :  { %v172_v25 = vpop.permute.xlu0 %171  ;;  %vm182_vm5 = vcmp.eq.s32.totalorder %v162_v24, %v178_v43 }
  0xb0   :  { %vm180_vm2 = vcmp.eq.s32.totalorder %v162_v24, %v172_v25  ;;  %v653_v48 = vsel %vm182_vm5, 1.0, %v922_v26 }
  0xb1   :  { %v651_v28 = vsel %vm180_vm2, 1.0, %v922_v26  ;;  %v192_v54 = vpack.c.bf16 %v653_v48, %v652_v47 }
  0xb2   :  { %v191_v29 = vpack.c.bf16 %v651_v28, %v650_v27  ;;  %v199_v44 = vpop.permute.xlu1 %198 }
  0xb3   :  { %v202_v46 = vpop.permute.xlu0 %201  ;;  %vm209_vm6 = vcmp.eq.s32.totalorder %v162_v24, %v199_v44 }
  0xb4   :  { %725 = vmatprep.mubr.msk.bf16.mxu1 %vm236_vm3, %v191_v29  ;;  %vm210_vm7 = vcmp.eq.s32.totalorder %v162_v24, %v202_v46  ;;  %v654_v55 = vsel %vm209_vm6, 1.0, %v922_v26 }
  0xb5   :  { %v655_v56 = vsel %vm210_vm7, 1.0, %v922_v26 }
  0xb6   :  { %v205_v45 = vpop.permute.xlu1 %204  ;;  %v221_v59 = vpack.c.bf16 %v655_v56, %v654_v55 }
  0xb7   :  { %vm211_vm8 = vcmp.eq.s32.totalorder %v162_v24, %v205_v45 }
  0xb8   :  { %v656_v63 = vsel %vm211_vm8, 1.0, %v922_v26 }
 0x10d   :  { %v722_v31 = vpop.f32.mrb[0].mxu0 }
 0x10e   :  { %v158_v32 = vadd.f32 %v722_v31, %v647_v30  ;;  %v152_v33 = vpop.f32.mrb[1].mxu0 }
 0x10f   :  { %v153_v34 = vadd.f32 %v647_v30, %v152_v33 }
 0x111   :  { %v223_v35 = vpack.c.bf16 %v158_v32, %v153_v34 }
 0x113   :  { %v224_v36 = vunpack.c.l.bf16 %v223_v35  ;;  %293 = vrot.lane.b32.xlu1 %v223_v35, %s923_s26  ;;  %v225_v37 = vunpack.c.h.bf16 %v223_v35 }
 0x115   :  { %v226_v38 = vsub.f32 %v153_v34, %v224_v36  ;;  %v227_v39 = vsub.f32 %v158_v32, %v225_v37 }
 0x117   :  { %v228_v40 = vpack.c.bf16 %v227_v39, %v226_v38 }
 0x119   :  { %230 = vrot.lane.b32.xlu0 %v228_v40, %s923_s26 }
 0x11d   :  { %207 = vperm.xlu0 %819, %v196_v41  }
 0x185   :  { %v294_v49 = vpop.permute.xlu1 %293 }
 0x186   :  { %v297_v57 = vsel %vm79_vm0, %v294_v49, %v228_v40 }
 0x18b   :  { %v231_v50 = vpop.permute.xlu0 %230 }
 0x18c   :  { %v234_v51 = vsel %vm79_vm0, %v223_v35, %v231_v50 }
 0x18d   :  { %723 = vmatprep.subr.bf16.mxu1 %v234_v51 }
 0x18e   :  { %724 = vmatpush3.bf16.msra.mxu1 %v234_v51 }
 0x18f   :  { %729 = vmatprep.subr.bf16.mxu1 %v297_v57 }
 0x191   :  { %726 = vmatmul.mubr.msk.bf16.vlgmr.msra.gmra.mrb[0].mxu1 %vm236_vm3, %v192_v54 }
 0x192   :  { %730 = vmatpush3.bf16.msra.mxu1 %v297_v57  ;;  %731 = vmatprep.mubr.msk.bf16.mxu1 %vm236_vm3, %v221_v59 }
 0x193   :  { %785 = vmatprep.subr.bf16.mxu1 %v784_v58 }
 0x19c   :  { %v208_v60 = vpop.permute.xlu0 %207 }
 0x19d   :  { %vm212_vm9 = vcmp.eq.s32.totalorder %v162_v24, %v208_v60  ;;  %v523_v60 = vld [vmem:[%s1140_s7] sm:$0x3] }
 0x19e   :  { %v657_v0 = vsel %vm212_vm9, 1.0, %v922_v26 }
 0x19f   :  { %v222_v1 = vpack.c.bf16 %v657_v0, %v656_v63 }
 0x1a1   :  { %732 = vmatmul.mubr.msk.bf16.vlgmr.msra.gmra.mrb[4].mxu1 %vm236_vm3, %v222_v1 }
 0x1a2   :  { %787 = vmatpush3.bf16.msra.mxu1 %v784_v58  ;;  %751 = vmatprep.mubr.msk.f32.mxu1 %vm79_vm0, %v394_v3 }
 0x1a3   :  { %789 = vmatprep.subr.bf16.mxu1 %v788_v2 }
 0x1a6   :  { %791 = vmatpush3.bf16.msra.mxu1 %v788_v2 }
 0x1a7   :  { %793 = vmatprep.subr.bf16.mxu1 %v792_v6 }
 0x1aa   :  { %795 = vmatpush3.bf16.msra.mxu1 %v792_v6 }
 0x1ab   :  { %797 = vmatprep.subr.bf16.mxu1 %v796_v9 }
 0x1ae   :  { %799 = vmatpush3.bf16.msra.mxu1 %v796_v9 }
 0x1b1   :  { %752 = vmatmul.mubr.msk.f32.vlgmr.msra.gmra.mrb[8].mxu1 %vm79_vm0, %v395_v10 }
 0x1b2   :  { %754 = vmatprep.mubr.msk.f32.mxu1 %vm79_vm0, %v396_v11 }
 0x1b5   :  { %755 = vmatmul.mubr.msk.f32.gmra.mrb[10].mxu1 %vm79_vm0, %v397_v12 }
 0x264   :  { %v727_v13 = vpop.f32.mrb[0].mxu1 }
 0x265   :  { %v277_v14 = vpop.f32.mrb[1].mxu1 }
 0x266   :  { %358 = vrot.lane.b32.xlu0 %v277_v14, %s923_s26  ;;  %v728_v15 = vpop.f32.mrb[2].mxu1 }
 0x267   :  { %v280_v16 = vpop.f32.mrb[3].mxu1 }
 0x268   :  { %360 = vrot.lane.b32.xlu1 %v280_v16, %s923_s26 }
 0x274   :  { %v733_v17 = vpop.f32.mrb[4].mxu1 }
 0x275   :  { %v339_v18 = vpop.f32.mrb[5].mxu1 }
 0x276   :  { %378 = vrot.lane.b32.xlu0 %v339_v18, %s923_s26  ;;  %v734_v20 = vpop.f32.mrb[6].mxu1 }
 0x277   :  { %v342_v21 = vpop.f32.mrb[7].mxu1 }
 0x278   :  { %380 = vrot.lane.b32.xlu1 %v342_v21, %s923_s26 }
 0x27a   :  { %362 = vrot.lane.b32.xlu0 %v727_v13, %s923_s26 }
 0x27c   :  { %364 = vrot.lane.b32.xlu1 %v728_v15, %s923_s26 }
 0x27e   :  { %382 = vrot.lane.b32.xlu0 %v733_v17, %s923_s26 }
 0x280   :  { %384 = vrot.lane.b32.xlu1 %v734_v20, %s923_s26 }
 0x284   :  { %v753_v22 = vpop.f32.mrb[8].mxu1 }
 0x285   :  { %v484_v23 = vpop.f32.mrb[9].mxu1 }
 0x288   :  { %v756_v24 = vpop.f32.mrb[10].mxu1 }
 0x289   :  { %v494_v25 = vpop.f32.mrb[11].mxu1 }
 0x2d8   :  { %v359_v27 = vpop.permute.xlu0 %358 }
 0x2d9   :  { %v370_v28 = vadd.f32 %v359_v27, %v277_v14 }
 0x2da   :  { %v361_v29 = vpop.permute.xlu1 %360 }
 0x2db   :  { %611 = vst.msk [vmem:[#allocation8] sm:$0xff] %vm79_vm0, %v370_v28  ;;  %v371_v30 = vadd.f32 %v361_v29, %v280_v16 }
 0x2dd   :  { %612 = vst.msk [vmem:[#allocation8 + $0x8] sm:$0xff] %vm79_vm0, %v371_v30 }
 0x2e8   :  { %v379_v31 = vpop.permute.xlu0 %378 }
 0x2e9   :  { %v390_v32 = vadd.f32 %v379_v31, %v339_v18 }
 0x2ea   :  { %v381_v33 = vpop.permute.xlu1 %380 }
 0x2eb   :  { %v391_v34 = vadd.f32 %v381_v33, %v342_v21  ;;  %v503_v35 = vadd.f32 %v390_v32, %v370_v28 }
 0x2ec   :  { %v363_v26 = vpop.permute.xlu0 %362 }
 0x2ed   :  { %v504_v36 = vadd.f32 %v391_v34, %v371_v30  ;;  %v372_v37 = vadd.f32 %v727_v13, %v363_v26  ;;  %v507_v38 = vadd.f32 %v503_v35, %v484_v23 }
 0x2ee   :  { %v365_v39 = vpop.permute.xlu1 %364 }
 0x2ef   :  { %v508_v40 = vadd.f32 %v753_v22, %v504_v36  ;;  %613 = vst.msk [vmem:[#allocation8 + $0x10] sm:$0xff] %vm79_vm0, %v372_v37  ;;  %v515_v41 = vmul.f32 0.1, %v507_v38  ;;  %v373_v42 = vadd.f32 %v728_v15, %v365_v39  ;;  %vm511_vm11 = vcmp.ge.f32.partialorder %v507_v38, 0.0 }
 0x2f0   :  { %v383_v43 = vpop.permute.xlu0 %382 }
 0x2f1   :  { %vm512_vm12 = vcmp.ge.f32.partialorder %v508_v40, 0.0  ;;  %v516_v44 = vmul.f32 0.1, %v508_v40  ;;  %614 = vst.msk [vmem:[#allocation8 + $0x18] sm:$0xff] %vm79_vm0, %v373_v42  ;;  %v392_v45 = vadd.f32 %v733_v17, %v383_v43  ;;  %v519_v48 = vsel %vm511_vm11, %v507_v38, %v515_v41 }
 0x2f2   :  { %v385_v46 = vpop.permute.xlu1 %384 }
 0x2f3   :  { %v520_v47 = vsel %vm512_vm12, %v508_v40, %v516_v44  ;;  %v393_v49 = vadd.f32 %v734_v20, %v385_v46  ;;  %v505_v50 = vadd.f32 %v392_v45, %v372_v37 }
 0x2f4   :  { %v801_v51 = vpack.c.bf16 %v520_v47, %v519_v48 }
 0x2f5   :  { %v506_v52 = vadd.f32 %v393_v49, %v373_v42  ;;  %v509_v53 = vadd.f32 %v505_v50, %v494_v25 }
 0x2f6   :  { %803 = vmatpush3.bf16.xpose.msk.msra.mxu0 %vm802_vm13, %v801_v51 }
 0x2f7   :  { %v510_v54 = vadd.f32 %v756_v24, %v506_v52  ;;  %v517_v55 = vmul.f32 0.1, %v509_v53  ;;  %804 = vmatprep.subr.bf16.mxu0 %v924_v19  ;;  %vm513_vm14 = vcmp.ge.f32.partialorder %v509_v53, 0.0 }
 0x2f9   :  { %vm514_vm15 = vcmp.ge.f32.partialorder %v510_v54, 0.0  ;;  %v518_v56 = vmul.f32 0.1, %v510_v54  ;;  %v521_v58 = vsel %vm513_vm14, %v509_v53, %v517_v55 }
 0x2fb   :  { %v522_v57 = vsel %vm514_vm15, %v510_v54, %v518_v56 }
 0x2fc   :  { %v805_v59 = vpack.c.bf16 %v522_v57, %v521_v58 }
 0x2fe   :  { %807 = vmatpush3.bf16.xpose.msk.msra.mxu0 %vm802_vm13, %v805_v59 }
 0x305   :  { %766 = vmatmul.mubr.msk.f32.vlgmr.msra.gmra.mrb[2].mxu0 %vm79_vm0, %v523_v60 }
 0x306   :  { %876 = shalt.err (!%p873_p6)
}
 0x307   :  { %s877_s10 = scalar_lea.hbm %s1142_s9, 512 }
 0x308   :  { %p878_p7 = scmp.ne.s32.totalorder %s1142_s9, %s877_s10  ;;  %p881_p8 = scmp.lt.u32.totalorder %s877_s10, %s1142_s9 }
 0x30a   :  { %p883_p9 = pnand %p881_p8, %p878_p7 }
 0x30c   :  { %886 = shalt.err (!%p883_p9)
}
 0x30d   :  { %636 = dma.vmem_to_hbm [thread:$0]  %s631_s30, 512, %s1142_s9, [#allocation9], %s918_s19, %s918_s19, %s919_s20   ;;  %vm609_vm0 = vcmask 254976  }
 0x30e   :  { %s927_s18 = smov [#allocation7]  }
 0x30f   :  { %s621_s6 = sshll.u32 %s927_s18, 4  ;;  %s622_s6 = int_to_ptr.vmem [resolvable:$true] %s621_s6 }
 0x310   :  { %s887_s21 = scalar_lea.vmem %s622_s6, 32  ;;  %p892_p11 = scmp.lt.s32.totalorder %s622_s6, %s622_s6 }
 0x311   :  { %p888_p10 = scmp.ne.s32.totalorder %s622_s6, %s887_s21  ;;  %p893_p12 = scmp.lt.s32.totalorder %s887_s21, %s887_s21 }
 0x313   :  { %p894_p13 = por %p893_p12, %p892_p11 }
 0x315   :  { %p895_p0 = pnand %p894_p13, %p888_p10 }
 0x3d8   :  { %v605_v61 = vpop.f32.mrb[2].mxu0 }
 0x3d9   :  { %v767_v62 = vpop.f32.mrb[3].mxu0  ;;  %610 = vst.msk [vmem:[#allocation7] sm:$0x3] %vm609_vm0, %v605_v61 }
 0x3da   :  { %898 = shalt.err (!%p895_p0)
}
 0x3db   :  { %s899_s23 = scalar_lea.hbm %s1141_s8, 32 }
 0x3dc   :  { %p900_p1 = scmp.ne.s32.totalorder %s1141_s8, %s899_s23  ;;  %p903_p2 = scmp.lt.u32.totalorder %s899_s23, %s1141_s8 }
 0x3de   :  { %p905_p3 = pnand %p903_p2, %p900_p1 }
 0x3e0   :  { %908 = shalt.err (!%p905_p3)
}
 0x3e1   :  { %624 = dma.vmem_to_hbm [thread:$0]  %s622_s6, 32, %s1141_s8, [#allocation4]  }
 0x3e2   :  { %913 = dma.done.wait [#allocation4], 32  }
 0x3e3   :  { %914 = vsyncadd [#allocation4], 4294967264 }
 0x3e4   :  { %915 = dma.done.wait [#allocation9], 512  }
 0x3e5   :  { %916 = vsyncadd [#allocation9], 4294966784 }
 0x3e6   :  { %643 = vsyncpa [#allocation3], 1 }
 0x3e7   :  { %644 = vsyncpa [#allocation6], 1 }
 0x3e8   :  { %645 = vsyncpa [#allocation4], 1 }
 0x3e9   :  { %646 = vsyncpa [#allocation9], 1 }

</bundles_post_ra>
